<compile_context>
chip_gen: v7x
topology: tpu7x:2x2x1
jax: 0.10.0
libtpu: 0.0.40
codegen_flags: <defaults>
</compile_context>

<pallas_src>
import functools

import jax
import jax.numpy as jnp
from jax.experimental import pallas as pl
from jax.experimental.pallas import tpu as pltpu


def _round_up(x: int, m: int) -> int:
    return ((x + m - 1) // m) * m


def _cdiv(a: int, b: int) -> int:
    return -(-a // b)


def _tpu_config():
    """Generation-aware core split / tile budget / VMEM limit (safe fallbacks)."""
    kind = ""
    try:
        kind = jax.devices()[0].device_kind.lower()
    except Exception:
        pass
    if "v7" in kind or "7x" in kind:
        # v7x: 2 TensorCores per chip but only 64 MiB VMEM per TC.
        return {"num_cores": 2, "core_sem": "core_parallel",
                "tile_budget": 24 << 20, "vmem_limit": 48 << 20}
    if "v6" in kind:
        # v6e: 1 TC, 128 MiB VMEM -> big tiles amortize the ~0.35 us/step overhead.
        return {"num_cores": 1, "core_sem": None,
                "tile_budget": 40 << 20, "vmem_limit": 96 << 20}
    if "v5p" in kind or "v4" in kind:
        # Megacore parts: 2 TCs behind one device; plain "parallel" splits the axis.
        return {"num_cores": 2, "core_sem": "parallel",
                "tile_budget": 32 << 20, "vmem_limit": 80 << 20}
    # v5e / unknown: 1 TC; scoped-VMEM default is only 16 MiB, raise it explicitly.
    return {"num_cores": 1, "core_sem": None,
            "tile_budget": 24 << 20, "vmem_limit": 64 << 20}


def _vae_loss_kernel(n_rows, tiles_per_core,
                     tl_ref, xhat_ref, mu_ref, lv_ref, out_ref, ce_acc, kld_acc):
    """Accumulate per-row CE / KL partials per tile; reduce once per core."""
    core = pl.program_id(0)
    i = pl.program_id(1)
    tile_n = xhat_ref.shape[0]

    @pl.when(i == 0)
    def _init():
        ce_acc[...] = jnp.zeros_like(ce_acc)
        kld_acc[...] = jnp.zeros_like(kld_acc)

    # Logical row ids of this tile -> mask the ragged tail (rows >= N contribute 0).
    row0 = (core * tiles_per_core + i) * tile_n
    rows = row0 + jax.lax.broadcasted_iota(jnp.int32, (tile_n, 1), 0)
    valid = rows < n_rows

    # ---- cross entropy per row: logsumexp(x) - x[label] ---------------------------
    x = xhat_ref[...].astype(jnp.float32)                        # (tile_n, C)
    m = jnp.max(x, axis=-1, keepdims=True)
    lse = m + jnp.log(jnp.sum(jnp.exp(x - m), axis=-1, keepdims=True))
    ce_rows = lse - tl_ref[...].astype(jnp.float32)              # (tile_n, 1)
    ce_acc[...] += jnp.where(valid, ce_rows, 0.0)

    # ---- KL per row (the -0.5 * kld_weight factor is applied in the wrapper) ------
    mu = mu_ref[...].astype(jnp.float32)                         # (tile_n, D)
    lv = lv_ref[...].astype(jnp.float32)
    kld_rows = jnp.sum(1.0 + lv - mu * mu - jnp.exp(lv), axis=-1, keepdims=True)
    kld_acc[...] += jnp.where(valid, kld_rows, 0.0)

    # ---- once per core: scalarize and write the resident output block -------------
    @pl.when(i == tiles_per_core - 1)
    def _finalize():
        ce_total = jnp.sum(ce_acc[...])
        kld_total = jnp.sum(kld_acc[...])
        sub = jax.lax.broadcasted_iota(jnp.int32, out_ref.shape, 1)
        out_ref[...] = (jnp.where(sub == 0, ce_total, 0.0)
                        + jnp.where(sub == 1, kld_total, 0.0))


def vae_loss(label, x_hat, mu, logvar, kld_weight: float = 0.001):
    """Pallas implementation of VAELoss.forward. Returns a scalar float32."""
    n, c = x_hat.shape
    d = mu.shape[1]

    cfg = _tpu_config()
    num_split = min(cfg["num_cores"], max(1, n // 8))

    # True-logit gather once in the wrapper (tiny (N,1) f32 array) instead of
    # streaming labels + a one-hot select pass over the widest tile in the kernel.
    true_logit = jnp.take_along_axis(
        x_hat, label.reshape(-1, 1).astype(jnp.int32), axis=-1).astype(jnp.float32)

    # ---- row-tile sizing: biggest tile whose double-buffered working set
    #      (inputs x2 + in-kernel f32 temps + accumulators) fits the per-core budget.
    itx = x_hat.dtype.itemsize
    itd = mu.dtype.itemsize
    bytes_per_row = (c * (2 * itx + 8)          # x_hat tile (x2 buffers) + f32 temps
                     + 2 * d * (2 * itd + 8)    # mu, logvar
                     + 2 * 128 * 4              # (tile_n, 1) accumulators (lane-padded)
                     + 64)                      # true_logit + slack
    max_tile = max(8, min(1024, (cfg["tile_budget"] // bytes_per_row) // 8 * 8))

    rows_per_core = _cdiv(n, num_split)
    tile_n = min(max_tile, _round_up(rows_per_core, 8))
    if num_split == 1 and tile_n >= n:
        tile_n, tiles_per_core = n, 1           # one block; row dim == full array dim
    else:
        tile_n = max(8, (tile_n // 8) * 8)
        tiles_per_core = _cdiv(rows_per_core, tile_n)

    row_map = lambda core, i: (core * tiles_per_core + i, 0)

    if num_split > 1 and cfg["core_sem"] == "core_parallel":
        dims = (pltpu.CORE_PARALLEL, pltpu.ARBITRARY)   # split rows across v7x's 2 TCs
    elif num_split > 1:
        dims = ("parallel", "arbitrary")
    else:
        dims = ("arbitrary", "arbitrary")

    cost = pl.CostEstimate(
        flops=int(n * (3 * c + 5 * d) + 8 * n),
        transcendentals=int(n * (c + d)),
        bytes_accessed=int(x_hat.size * itx + (mu.size + logvar.size) * itd
                           + true_logit.size * 4 + num_split * 8 * 128 * 4))

    def build(dim_sem, vmem_limit):
        # NOTE: if a profile ever shows exposed DMA after enlarging tiles, sweep
        #       pipeline_mode=pl.Buffered(3) on the x_hat BlockSpec.
        return pl.pallas_call(
            functools.partial(_vae_loss_kernel, n, tiles_per_core),
            out_shape=jax.ShapeDtypeStruct((num_split, 8, 128), jnp.float32),
            grid_spec=pltpu.PrefetchScalarGridSpec(
                num_scalar_prefetch=0,
                grid=(num_split, tiles_per_core),
                in_specs=[
                    pl.BlockSpec((tile_n, 1), row_map),    # true logit (f32)
                    pl.BlockSpec((tile_n, c), row_map),    # x_hat logits (input dtype)
                    pl.BlockSpec((tile_n, d), row_map),    # mu
                    pl.BlockSpec((tile_n, d), row_map),    # logvar
                ],
                out_specs=pl.BlockSpec((1, 8, 128), lambda core, i: (core, 0, 0)),
                scratch_shapes=[pltpu.VMEM((tile_n, 1), jnp.float32),
                                pltpu.VMEM((tile_n, 1), jnp.float32)],
            ),
            compiler_params=pltpu.CompilerParams(
                dimension_semantics=dim_sem, vmem_limit_bytes=vmem_limit),
            cost_estimate=cost,
        )

    try:
        partials = build(dims, cfg["vmem_limit"])(true_logit, x_hat, mu, logvar)
    except Exception:
        # Conservative fallback (e.g. CORE_PARALLEL unsupported on this part).
        partials = build(("arbitrary", "arbitrary"), None)(true_logit, x_hat, mu, logvar)

    # Cheap scalar combine in the wrapper: changing kld_weight never recompiles.
    ce_sum = jnp.sum(partials[:, 0, 0])
    kld_sum = jnp.sum(partials[:, 1, 0])
    recons_loss = ce_sum / jnp.float32(n)
    kld_loss = -0.5 * kld_sum
    return recons_loss + jnp.float32(kld_weight) * kld_loss


def _vae_loss_ref(label, x_hat, mu, logvar, kld_weight: float = 0.001):
    """Pure-JAX reference mirroring torch semantics."""
    logp = jax.nn.log_softmax(x_hat.astype(jnp.float32), axis=-1)
    recons = -jnp.mean(jnp.take_along_axis(logp, label[:, None], axis=-1))
    kld = -0.5 * jnp.sum(1.0 + logvar - mu ** 2 - jnp.exp(logvar))
    return recons + kld_weight * kld


if __name__ == "__main__":
    key = jax.random.PRNGKey(0)
    k1, k2, k3, k4 = jax.random.split(key, 4)

    N, C, D = 8, 16, 32          # batch, num classes, latent dim
    label = jax.random.randint(k1, (N,), 0, C, dtype=jnp.int32)
    x_hat = jax.random.normal(k2, (N, C), dtype=jnp.float32)
    mu = jax.random.normal(k3, (N, D), dtype=jnp.float32) * 0.5
    logvar = jax.random.normal(k4, (N, D), dtype=jnp.float32) * 0.1

    out = jax.block_until_ready(vae_loss(label, x_hat, mu, logvar, kld_weight=0.001))
    ref = _vae_loss_ref(label, x_hat, mu, logvar, kld_weight=0.001)
    assert jnp.allclose(out, ref, rtol=1e-5, atol=1e-5), (out, ref)

    # Ragged, non-multiple-of-8/128 shapes exercise the in-kernel tail masking path.
    N2, C2, D2 = 37, 10, 24
    kk = jax.random.split(jax.random.PRNGKey(1), 4)
    label2 = jax.random.randint(kk[0], (N2,), 0, C2, dtype=jnp.int32)
    x2 = jax.random.normal(kk[1], (N2, C2), dtype=jnp.float32)
    mu2 = jax.random.normal(kk[2], (N2, D2), dtype=jnp.float32) * 0.3
    lv2 = jax.random.normal(kk[3], (N2, D2), dtype=jnp.float32) * 0.2

    out2 = jax.block_until_ready(vae_loss(label2, x2, mu2, lv2, kld_weight=0.001))
    ref2 = _vae_loss_ref(label2, x2, mu2, lv2, kld_weight=0.001)
    assert jnp.allclose(out2, ref2, rtol=1e-4, atol=1e-4), (out2, ref2)

    print("KERNEL_OK")
</pallas_src>

<mosaic_0001>
module attributes {stable_mosaic.version = 11 : i64} {
  func.func @_vae_loss_kernel(%arg0: i32, %arg1: i32, %arg2: memref<8x1xf32, #tpu.memory_space<vmem>>, %arg3: memref<8x16xf32, #tpu.memory_space<vmem>>, %arg4: memref<8x32xf32, #tpu.memory_space<vmem>>, %arg5: memref<8x32xf32, #tpu.memory_space<vmem>>, %arg6: memref<1x8x128xf32, #tpu.memory_space<vmem>>, %arg7: memref<8x1xf32, #tpu.memory_space<vmem>>, %arg8: memref<8x1xf32, #tpu.memory_space<vmem>>) attributes {dimension_semantics = [#tpu.dimension_semantics<arbitrary>, #tpu.dimension_semantics<arbitrary>], iteration_bounds = array<i64: 1, 1>, scalar_prefetch = 0 : i64, scratch_operands = 2 : i64, tpu.core_type = #tpu.core_type<tc>, window_params = [{transform_indices = @transform_0, window_bounds = array<i64: 8, 1>}, {transform_indices = @transform_1, window_bounds = array<i64: 8, 16>}, {transform_indices = @transform_2, window_bounds = array<i64: 8, 32>}, {transform_indices = @transform_3, window_bounds = array<i64: 8, 32>}, {transform_indices = @transform_4, window_bounds = array<i64: 1, 8, 128>}]} {
    %c0_i32 = arith.constant 0 : i32
    %0 = arith.cmpi eq, %arg1, %c0_i32 : i32
    %1 = arith.extui %0 : i1 to i32
    %c0_i32_0 = arith.constant 0 : i32
    %2 = arith.cmpi ne, %1, %c0_i32_0 : i32
    scf.if %2 {
      %cst_24 = arith.constant 0.000000e+00 : f32
      %46 = vector.broadcast %cst_24 : f32 to vector<8x1xf32>
      %c0_25 = arith.constant 0 : index
      %c0_26 = arith.constant 0 : index
      %47 = vector.load %arg7[%c0_25, %c0_26] : memref<8x1xf32, #tpu.memory_space<vmem>>, vector<8x1xf32>
      tpu.vector_store %arg7[%c0_25, %c0_26], %46 {strides = array<i32>} : memref<8x1xf32, #tpu.memory_space<vmem>>, vector<8x1xf32>,
      %cst_27 = arith.constant 0.000000e+00 : f32
      %48 = vector.broadcast %cst_27 : f32 to vector<8x1xf32>
      %c0_28 = arith.constant 0 : index
      %c0_29 = arith.constant 0 : index
      %49 = vector.load %arg8[%c0_28, %c0_29] : memref<8x1xf32, #tpu.memory_space<vmem>>, vector<8x1xf32>
      tpu.vector_store %arg8[%c0_28, %c0_29], %48 {strides = array<i32>} : memref<8x1xf32, #tpu.memory_space<vmem>>, vector<8x1xf32>,
    } else {
    }
    %c1_i32 = arith.constant 1 : i32
    %3 = arith.muli %arg0, %c1_i32 : i32
    %4 = arith.addi %3, %arg1 : i32
    %c8_i32 = arith.constant 8 : i32
    %5 = arith.muli %4, %c8_i32 : i32
    %6 = tpu.iota {dimensions = array<i32: 0>} : vector<8x1xi32>
    %7 = vector.broadcast %5 : i32 to vector<8x1xi32>
    %8 = arith.addi %7, %6 : vector<8x1xi32>
    %c8_i32_1 = arith.constant 8 : i32
    %9 = vector.broadcast %c8_i32_1 : i32 to vector<8x1xi32>
    %10 = arith.cmpi slt, %8, %9 : vector<8x1xi32>
    %c0 = arith.constant 0 : index
    %c0_2 = arith.constant 0 : index
    %11 = vector.load %arg3[%c0, %c0_2] : memref<8x16xf32, #tpu.memory_space<vmem>>, vector<8x16xf32>
    %cst = arith.constant dense<0xFF800000> : vector<8xf32>
    %12 = vector.multi_reduction <maximumf>, %11, %cst [1] : vector<8x16xf32> to vector<8xf32>
    %13 = vector.shape_cast %12 : vector<8xf32> to vector<8x1xf32>
    %14 = vector.broadcast %13 : vector<8x1xf32> to vector<8x16xf32>
    %15 = arith.subf %11, %14 : vector<8x16xf32>
    %16 = math.exp %15 : vector<8x16xf32>
    %cst_3 = arith.constant dense<0.000000e+00> : vector<8xf32>
    %17 = vector.multi_reduction <add>, %16, %cst_3 [1] : vector<8x16xf32> to vector<8xf32>
    %18 = vector.shape_cast %17 : vector<8xf32> to vector<8x1xf32>
    %19 = math.log %18 : vector<8x1xf32>
    %20 = arith.addf %13, %19 : vector<8x1xf32>
    %c0_4 = arith.constant 0 : index
    %c0_5 = arith.constant 0 : index
    %21 = vector.load %arg2[%c0_4, %c0_5] : memref<8x1xf32, #tpu.memory_space<vmem>>, vector<8x1xf32>
    %22 = arith.subf %20, %21 : vector<8x1xf32>
    %c0_6 = arith.constant 0 : index
    %c0_7 = arith.constant 0 : index
    %23 = vector.load %arg7[%c0_6, %c0_7] : memref<8x1xf32, #tpu.memory_space<vmem>>, vector<8x1xf32>
    %cst_8 = arith.constant 0.000000e+00 : f32
    %24 = vector.broadcast %cst_8 : f32 to vector<8x1xf32>
    %25 = arith.select %10, %22, %24 : vector<8x1xi1>, vector<8x1xf32>
    %26 = arith.addf %23, %25 : vector<8x1xf32>
    %c0_9 = arith.constant 0 : index
    %c0_10 = arith.constant 0 : index
    %27 = vector.load %arg7[%c0_9, %c0_10] : memref<8x1xf32, #tpu.memory_space<vmem>>, vector<8x1xf32>
    tpu.vector_store %arg7[%c0_9, %c0_10], %26 {strides = array<i32>} : memref<8x1xf32, #tpu.memory_space<vmem>>, vector<8x1xf32>,
    %c0_11 = arith.constant 0 : index
    %c0_12 = arith.constant 0 : index
    %28 = vector.load %arg4[%c0_11, %c0_12] : memref<8x32xf32, #tpu.memory_space<vmem>>, vector<8x32xf32>
    %c0_13 = arith.constant 0 : index
    %c0_14 = arith.constant 0 : index
    %29 = vector.load %arg5[%c0_13, %c0_14] : memref<8x32xf32, #tpu.memory_space<vmem>>, vector<8x32xf32>
    %cst_15 = arith.constant 1.000000e+00 : f32
    %30 = vector.broadcast %cst_15 : f32 to vector<8x32xf32>
    %31 = arith.addf %30, %29 : vector<8x32xf32>
    %32 = arith.mulf %28, %28 : vector<8x32xf32>
    %33 = arith.subf %31, %32 : vector<8x32xf32>
    %34 = math.exp %29 : vector<8x32xf32>
    %35 = arith.subf %33, %34 : vector<8x32xf32>
    %cst_16 = arith.constant dense<0.000000e+00> : vector<8xf32>
    %36 = vector.multi_reduction <add>, %35, %cst_16 [1] : vector<8x32xf32> to vector<8xf32>
    %37 = vector.shape_cast %36 : vector<8xf32> to vector<8x1xf32>
    %c0_17 = arith.constant 0 : index
    %c0_18 = arith.constant 0 : index
    %38 = vector.load %arg8[%c0_17, %c0_18] : memref<8x1xf32, #tpu.memory_space<vmem>>, vector<8x1xf32>
    %cst_19 = arith.constant 0.000000e+00 : f32
    %39 = vector.broadcast %cst_19 : f32 to vector<8x1xf32>
    %40 = arith.select %10, %37, %39 : vector<8x1xi1>, vector<8x1xf32>
    %41 = arith.addf %38, %40 : vector<8x1xf32>
    %c0_20 = arith.constant 0 : index
    %c0_21 = arith.constant 0 : index
    %42 = vector.load %arg8[%c0_20, %c0_21] : memref<8x1xf32, #tpu.memory_space<vmem>>, vector<8x1xf32>
    tpu.vector_store %arg8[%c0_20, %c0_21], %41 {strides = array<i32>} : memref<8x1xf32, #tpu.memory_space<vmem>>, vector<8x1xf32>,
    %c0_i32_22 = arith.constant 0 : i32
    %43 = arith.cmpi eq, %arg1, %c0_i32_22 : i32
    %44 = arith.extui %43 : i1 to i32
    %c0_i32_23 = arith.constant 0 : i32
    %45 = arith.cmpi ne, %44, %c0_i32_23 : i32
    scf.if %45 {
      %c0_24 = arith.constant 0 : index
      %c0_25 = arith.constant 0 : index
      %46 = vector.load %arg7[%c0_24, %c0_25] : memref<8x1xf32, #tpu.memory_space<vmem>>, vector<8x1xf32>
      %47 = vector.shape_cast %46 : vector<8x1xf32> to vector<1x8x1xf32>
      %cst_26 = arith.constant dense<0.000000e+00> : vector<1xf32>
      %48 = vector.multi_reduction <add>, %47, %cst_26 [1, 2] : vector<1x8x1xf32> to vector<1xf32>
      %49 = vector.shape_cast %48 : vector<1xf32> to vector<1x1x1xf32>
      %50 = vector.extract %49[0, 0, 0] : f32 from vector<1x1x1xf32>
      %c0_27 = arith.constant 0 : index
      %c0_28 = arith.constant 0 : index
      %51 = vector.load %arg8[%c0_27, %c0_28] : memref<8x1xf32, #tpu.memory_space<vmem>>, vector<8x1xf32>
      %52 = vector.shape_cast %51 : vector<8x1xf32> to vector<1x8x1xf32>
      %cst_29 = arith.constant dense<0.000000e+00> : vector<1xf32>
      %53 = vector.multi_reduction <add>, %52, %cst_29 [1, 2] : vector<1x8x1xf32> to vector<1xf32>
      %54 = vector.shape_cast %53 : vector<1xf32> to vector<1x1x1xf32>
      %55 = vector.extract %54[0, 0, 0] : f32 from vector<1x1x1xf32>
      %56 = tpu.iota {dimensions = array<i32: 1>} : vector<1x8x128xi32>
      %c0_i32_30 = arith.constant 0 : i32
      %57 = vector.broadcast %c0_i32_30 : i32 to vector<1x8x128xi32>
      %58 = arith.cmpi eq, %56, %57 : vector<1x8x128xi32>
      %cst_31 = arith.constant 0.000000e+00 : f32
      %59 = vector.broadcast %50 : f32 to vector<1x8x128xf32>
      %60 = vector.broadcast %cst_31 : f32 to vector<1x8x128xf32>
      %61 = arith.select %58, %59, %60 : vector<1x8x128xi1>, vector<1x8x128xf32>
      %c1_i32_32 = arith.constant 1 : i32
      %62 = vector.broadcast %c1_i32_32 : i32 to vector<1x8x128xi32>
      %63 = arith.cmpi eq, %56, %62 : vector<1x8x128xi32>
      %cst_33 = arith.constant 0.000000e+00 : f32
      %64 = vector.broadcast %55 : f32 to vector<1x8x128xf32>
      %65 = vector.broadcast %cst_33 : f32 to vector<1x8x128xf32>
      %66 = arith.select %63, %64, %65 : vector<1x8x128xi1>, vector<1x8x128xf32>
      %67 = arith.addf %61, %66 : vector<1x8x128xf32>
      %c0_34 = arith.constant 0 : index
      %c0_35 = arith.constant 0 : index
      %c0_36 = arith.constant 0 : index
      %68 = vector.load %arg6[%c0_34, %c0_35, %c0_36] : memref<1x8x128xf32, #tpu.memory_space<vmem>>, vector<1x8x128xf32>
      tpu.vector_store %arg6[%c0_34, %c0_35, %c0_36], %67 {strides = array<i32>} : memref<1x8x128xf32, #tpu.memory_space<vmem>>, vector<1x8x128xf32>,
    } else {
    }
    return
  }
  func.func @transform_0(%arg0: i32, %arg1: i32) -> (i32, i32) {
    %c1_i32 = arith.constant 1 : i32
    %0 = arith.muli %arg0, %c1_i32 : i32
    %1 = arith.addi %0, %arg1 : i32
    %c0_i32 = arith.constant 0 : i32
    %c0_i32_0 = arith.constant 0 : i32
    return %1, %c0_i32 : i32, i32
  }
  func.func @transform_1(%arg0: i32, %arg1: i32) -> (i32, i32) {
    %c1_i32 = arith.constant 1 : i32
    %0 = arith.muli %arg0, %c1_i32 : i32
    %1 = arith.addi %0, %arg1 : i32
    %c0_i32 = arith.constant 0 : i32
    %c0_i32_0 = arith.constant 0 : i32
    return %1, %c0_i32 : i32, i32
  }
  func.func @transform_2(%arg0: i32, %arg1: i32) -> (i32, i32) {
    %c1_i32 = arith.constant 1 : i32
    %0 = arith.muli %arg0, %c1_i32 : i32
    %1 = arith.addi %0, %arg1 : i32
    %c0_i32 = arith.constant 0 : i32
    %c0_i32_0 = arith.constant 0 : i32
    return %1, %c0_i32 : i32, i32
  }
  func.func @transform_3(%arg0: i32, %arg1: i32) -> (i32, i32) {
    %c1_i32 = arith.constant 1 : i32
    %0 = arith.muli %arg0, %c1_i32 : i32
    %1 = arith.addi %0, %arg1 : i32
    %c0_i32 = arith.constant 0 : i32
    %c0_i32_0 = arith.constant 0 : i32
    return %1, %c0_i32 : i32, i32
  }
  func.func @transform_4(%arg0: i32, %arg1: i32) -> (i32, i32, i32) {
    %c0_i32 = arith.constant 0 : i32
    %c0_i32_0 = arith.constant 0 : i32
    %c0_i32_1 = arith.constant 0 : i32
    return %arg0, %c0_i32, %c0_i32_0 : i32, i32, i32
  }
}

module attributes {stable_mosaic.version = 11 : i64} {
  func.func @_vae_loss_kernel(%arg0: i32, %arg1: i32, %arg2: memref<8x1xf32, #tpu.memory_space<vmem>>, %arg3: memref<8x16xf32, #tpu.memory_space<vmem>>, %arg4: memref<8x32xf32, #tpu.memory_space<vmem>>, %arg5: memref<8x32xf32, #tpu.memory_space<vmem>>, %arg6: memref<1x8x128xf32, #tpu.memory_space<vmem>>, %arg7: memref<8x1xf32, #tpu.memory_space<vmem>>, %arg8: memref<8x1xf32, #tpu.memory_space<vmem>>) attributes {dimension_semantics = [#tpu.dimension_semantics<arbitrary>, #tpu.dimension_semantics<arbitrary>], iteration_bounds = array<i64: 1, 1>, scalar_prefetch = 0 : i64, scratch_operands = 2 : i64, tpu.core_type = #tpu.core_type<tc>, window_params = [{transform_indices = @transform_0, window_bounds = array<i64: 8, 1>}, {transform_indices = @transform_1, window_bounds = array<i64: 8, 16>}, {transform_indices = @transform_2, window_bounds = array<i64: 8, 32>}, {transform_indices = @transform_3, window_bounds = array<i64: 8, 32>}, {transform_indices = @transform_4, window_bounds = array<i64: 1, 8, 128>}]} {
    %c0_i32 = arith.constant 0 : i32
    %0 = arith.cmpi eq, %arg1, %c0_i32 : i32
    %1 = arith.extui %0 : i1 to i32
    %c0_i32_0 = arith.constant 0 : i32
    %2 = arith.cmpi ne, %1, %c0_i32_0 : i32
    scf.if %2 {
      %cst_24 = arith.constant 0.000000e+00 : f32
      %46 = vector.broadcast %cst_24 : f32 to vector<8x1xf32>
      %c0_25 = arith.constant 0 : index
      %c0_26 = arith.constant 0 : index
      %47 = vector.load %arg7[%c0_25, %c0_26] : memref<8x1xf32, #tpu.memory_space<vmem>>, vector<8x1xf32>
      tpu.vector_store %arg7[%c0_25, %c0_26], %46 {strides = array<i32>} : memref<8x1xf32, #tpu.memory_space<vmem>>, vector<8x1xf32>,
      %cst_27 = arith.constant 0.000000e+00 : f32
      %48 = vector.broadcast %cst_27 : f32 to vector<8x1xf32>
      %c0_28 = arith.constant 0 : index
      %c0_29 = arith.constant 0 : index
      %49 = vector.load %arg8[%c0_28, %c0_29] : memref<8x1xf32, #tpu.memory_space<vmem>>, vector<8x1xf32>
      tpu.vector_store %arg8[%c0_28, %c0_29], %48 {strides = array<i32>} : memref<8x1xf32, #tpu.memory_space<vmem>>, vector<8x1xf32>,
    } else {
    }
    %c1_i32 = arith.constant 1 : i32
    %3 = arith.muli %arg0, %c1_i32 : i32
    %4 = arith.addi %3, %arg1 : i32
    %c8_i32 = arith.constant 8 : i32
    %5 = arith.muli %4, %c8_i32 : i32
    %6 = tpu.iota {dimensions = array<i32: 0>} : vector<8x1xi32>
    %7 = vector.broadcast %5 : i32 to vector<8x1xi32>
    %8 = arith.addi %7, %6 : vector<8x1xi32>
    %c8_i32_1 = arith.constant 8 : i32
    %9 = vector.broadcast %c8_i32_1 : i32 to vector<8x1xi32>
    %10 = arith.cmpi slt, %8, %9 : vector<8x1xi32>
    %c0 = arith.constant 0 : index
    %c0_2 = arith.constant 0 : index
    %11 = vector.load %arg3[%c0, %c0_2] : memref<8x16xf32, #tpu.memory_space<vmem>>, vector<8x16xf32>
    %cst = arith.constant dense<0xFF800000> : vector<8xf32>
    %12 = vector.multi_reduction <maximumf>, %11, %cst [1] : vector<8x16xf32> to vector<8xf32>
    %13 = vector.shape_cast %12 : vector<8xf32> to vector<8x1xf32>
    %14 = vector.broadcast %13 : vector<8x1xf32> to vector<8x16xf32>
    %15 = arith.subf %11, %14 : vector<8x16xf32>
    %16 = math.exp %15 : vector<8x16xf32>
    %cst_3 = arith.constant dense<0.000000e+00> : vector<8xf32>
    %17 = vector.multi_reduction <add>, %16, %cst_3 [1] : vector<8x16xf32> to vector<8xf32>
    %18 = vector.shape_cast %17 : vector<8xf32> to vector<8x1xf32>
    %19 = math.log %18 : vector<8x1xf32>
    %20 = arith.addf %13, %19 : vector<8x1xf32>
    %c0_4 = arith.constant 0 : index
    %c0_5 = arith.constant 0 : index
    %21 = vector.load %arg2[%c0_4, %c0_5] : memref<8x1xf32, #tpu.memory_space<vmem>>, vector<8x1xf32>
    %22 = arith.subf %20, %21 : vector<8x1xf32>
    %c0_6 = arith.constant 0 : index
    %c0_7 = arith.constant 0 : index
    %23 = vector.load %arg7[%c0_6, %c0_7] : memref<8x1xf32, #tpu.memory_space<vmem>>, vector<8x1xf32>
    %cst_8 = arith.constant 0.000000e+00 : f32
    %24 = vector.broadcast %cst_8 : f32 to vector<8x1xf32>
    %25 = arith.select %10, %22, %24 : vector<8x1xi1>, vector<8x1xf32>
    %26 = arith.addf %23, %25 : vector<8x1xf32>
    %c0_9 = arith.constant 0 : index
    %c0_10 = arith.constant 0 : index
    %27 = vector.load %arg7[%c0_9, %c0_10] : memref<8x1xf32, #tpu.memory_space<vmem>>, vector<8x1xf32>
    tpu.vector_store %arg7[%c0_9, %c0_10], %26 {strides = array<i32>} : memref<8x1xf32, #tpu.memory_space<vmem>>, vector<8x1xf32>,
    %c0_11 = arith.constant 0 : index
    %c0_12 = arith.constant 0 : index
    %28 = vector.load %arg4[%c0_11, %c0_12] : memref<8x32xf32, #tpu.memory_space<vmem>>, vector<8x32xf32>
    %c0_13 = arith.constant 0 : index
    %c0_14 = arith.constant 0 : index
    %29 = vector.load %arg5[%c0_13, %c0_14] : memref<8x32xf32, #tpu.memory_space<vmem>>, vector<8x32xf32>
    %cst_15 = arith.constant 1.000000e+00 : f32
    %30 = vector.broadcast %cst_15 : f32 to vector<8x32xf32>
    %31 = arith.addf %30, %29 : vector<8x32xf32>
    %32 = arith.mulf %28, %28 : vector<8x32xf32>
    %33 = arith.subf %31, %32 : vector<8x32xf32>
    %34 = math.exp %29 : vector<8x32xf32>
    %35 = arith.subf %33, %34 : vector<8x32xf32>
    %cst_16 = arith.constant dense<0.000000e+00> : vector<8xf32>
    %36 = vector.multi_reduction <add>, %35, %cst_16 [1] : vector<8x32xf32> to vector<8xf32>
    %37 = vector.shape_cast %36 : vector<8xf32> to vector<8x1xf32>
    %c0_17 = arith.constant 0 : index
    %c0_18 = arith.constant 0 : index
    %38 = vector.load %arg8[%c0_17, %c0_18] : memref<8x1xf32, #tpu.memory_space<vmem>>, vector<8x1xf32>
    %cst_19 = arith.constant 0.000000e+00 : f32
    %39 = vector.broadcast %cst_19 : f32 to vector<8x1xf32>
    %40 = arith.select %10, %37, %39 : vector<8x1xi1>, vector<8x1xf32>
    %41 = arith.addf %38, %40 : vector<8x1xf32>
    %c0_20 = arith.constant 0 : index
    %c0_21 = arith.constant 0 : index
    %42 = vector.load %arg8[%c0_20, %c0_21] : memref<8x1xf32, #tpu.memory_space<vmem>>, vector<8x1xf32>
    tpu.vector_store %arg8[%c0_20, %c0_21], %41 {strides = array<i32>} : memref<8x1xf32, #tpu.memory_space<vmem>>, vector<8x1xf32>,
    %c0_i32_22 = arith.constant 0 : i32
    %43 = arith.cmpi eq, %arg1, %c0_i32_22 : i32
    %44 = arith.extui %43 : i1 to i32
    %c0_i32_23 = arith.constant 0 : i32
    %45 = arith.cmpi ne, %44, %c0_i32_23 : i32
    scf.if %45 {
      %c0_24 = arith.constant 0 : index
      %c0_25 = arith.constant 0 : index
      %46 = vector.load %arg7[%c0_24, %c0_25] : memref<8x1xf32, #tpu.memory_space<vmem>>, vector<8x1xf32>
      %47 = vector.shape_cast %46 : vector<8x1xf32> to vector<1x8x1xf32>
      %cst_26 = arith.constant dense<0.000000e+00> : vector<1xf32>
      %48 = vector.multi_reduction <add>, %47, %cst_26 [1, 2] : vector<1x8x1xf32> to vector<1xf32>
      %49 = vector.shape_cast %48 : vector<1xf32> to vector<1x1x1xf32>
      %50 = vector.extract %49[0, 0, 0] : f32 from vector<1x1x1xf32>
      %c0_27 = arith.constant 0 : index
      %c0_28 = arith.constant 0 : index
      %51 = vector.load %arg8[%c0_27, %c0_28] : memref<8x1xf32, #tpu.memory_space<vmem>>, vector<8x1xf32>
      %52 = vector.shape_cast %51 : vector<8x1xf32> to vector<1x8x1xf32>
      %cst_29 = arith.constant dense<0.000000e+00> : vector<1xf32>
      %53 = vector.multi_reduction <add>, %52, %cst_29 [1, 2] : vector<1x8x1xf32> to vector<1xf32>
      %54 = vector.shape_cast %53 : vector<1xf32> to vector<1x1x1xf32>
      %55 = vector.extract %54[0, 0, 0] : f32 from vector<1x1x1xf32>
      %56 = tpu.iota {dimensions = array<i32: 1>} : vector<1x8x128xi32>
      %c0_i32_30 = arith.constant 0 : i32
      %57 = vector.broadcast %c0_i32_30 : i32 to vector<1x8x128xi32>
      %58 = arith.cmpi eq, %56, %57 : vector<1x8x128xi32>
      %cst_31 = arith.constant 0.000000e+00 : f32
      %59 = vector.broadcast %50 : f32 to vector<1x8x128xf32>
      %60 = vector.broadcast %cst_31 : f32 to vector<1x8x128xf32>
      %61 = arith.select %58, %59, %60 : vector<1x8x128xi1>, vector<1x8x128xf32>
      %c1_i32_32 = arith.constant 1 : i32
      %62 = vector.broadcast %c1_i32_32 : i32 to vector<1x8x128xi32>
      %63 = arith.cmpi eq, %56, %62 : vector<1x8x128xi32>
      %cst_33 = arith.constant 0.000000e+00 : f32
      %64 = vector.broadcast %55 : f32 to vector<1x8x128xf32>
      %65 = vector.broadcast %cst_33 : f32 to vector<1x8x128xf32>
      %66 = arith.select %63, %64, %65 : vector<1x8x128xi1>, vector<1x8x128xf32>
      %67 = arith.addf %61, %66 : vector<1x8x128xf32>
      %c0_34 = arith.constant 0 : index
      %c0_35 = arith.constant 0 : index
      %c0_36 = arith.constant 0 : index
      %68 = vector.load %arg6[%c0_34, %c0_35, %c0_36] : memref<1x8x128xf32, #tpu.memory_space<vmem>>, vector<1x8x128xf32>
      tpu.vector_store %arg6[%c0_34, %c0_35, %c0_36], %67 {strides = array<i32>} : memref<1x8x128xf32, #tpu.memory_space<vmem>>, vector<1x8x128xf32>,
    } else {
    }
    return
  }
  func.func @transform_0(%arg0: i32, %arg1: i32) -> (i32, i32) {
    %c1_i32 = arith.constant 1 : i32
    %0 = arith.muli %arg0, %c1_i32 : i32
    %1 = arith.addi %0, %arg1 : i32
    %c0_i32 = arith.constant 0 : i32
    %c0_i32_0 = arith.constant 0 : i32
    return %1, %c0_i32 : i32, i32
  }
  func.func @transform_1(%arg0: i32, %arg1: i32) -> (i32, i32) {
    %c1_i32 = arith.constant 1 : i32
    %0 = arith.muli %arg0, %c1_i32 : i32
    %1 = arith.addi %0, %arg1 : i32
    %c0_i32 = arith.constant 0 : i32
    %c0_i32_0 = arith.constant 0 : i32
    return %1, %c0_i32 : i32, i32
  }
  func.func @transform_2(%arg0: i32, %arg1: i32) -> (i32, i32) {
    %c1_i32 = arith.constant 1 : i32
    %0 = arith.muli %arg0, %c1_i32 : i32
    %1 = arith.addi %0, %arg1 : i32
    %c0_i32 = arith.constant 0 : i32
    %c0_i32_0 = arith.constant 0 : i32
    return %1, %c0_i32 : i32, i32
  }
  func.func @transform_3(%arg0: i32, %arg1: i32) -> (i32, i32) {
    %c1_i32 = arith.constant 1 : i32
    %0 = arith.muli %arg0, %c1_i32 : i32
    %1 = arith.addi %0, %arg1 : i32
    %c0_i32 = arith.constant 0 : i32
    %c0_i32_0 = arith.constant 0 : i32
    return %1, %c0_i32 : i32, i32
  }
  func.func @transform_4(%arg0: i32, %arg1: i32) -> (i32, i32, i32) {
    %c0_i32 = arith.constant 0 : i32
    %c0_i32_0 = arith.constant 0 : i32
    %c0_i32_1 = arith.constant 0 : i32
    return %arg0, %c0_i32, %c0_i32_0 : i32, i32, i32
  }
}

</mosaic_0001>

<bundles_post_ra>
// kernel: tpu_custom_call.1
= control target key start
LH: loop header
LB: loop body
LE: loop exit
PB: predicated region body
PF: predicated region fallthrough
CT: control target
= control target key end

     0   :  { %9 = vsyncpa [#allocation5], 0  ;;  %s415_s0 = inlined_call_operand.hbm [shape: f32[8,1], index: 0, kind: input, shape index: {}]   ;;  %s416_s1 = inlined_call_operand.hbm [shape: f32[8,16], index: 1, kind: input, shape index: {}]   ;;  %s417_s2 = inlined_call_operand.hbm [shape: f32[8,32], index: 2, kind: input, shape index: {}]   ;;  %s418_s3 = inlined_call_operand.hbm [shape: f32[8,32], index: 3, kind: input, shape index: {}]   ;;  %s419_s4 = inlined_call_operand.hbm [shape: f32[1,8,128], index: 4, kind: output, shape index: {}]  }
   0x1   :  { %10 = vsyncpa [#allocation8], 0 }
   0x2   :  { %11 = vsyncpa [#allocation11], 0 }
   0x3   :  { %12 = vsyncpa [#allocation6], 0  ;;  %s316_s15 = smov [#allocation7]   ;;  %s317_s17 = smov [#allocation4]  }
   0x4   :  { %s35_s16 = sshll.u32 %s316_s15, 4  ;;  %s22_s18 = sshll.u32 %s317_s17, 4  ;;  %s36_s16 = int_to_ptr.vmem [resolvable:$true] %s35_s16  ;;  %s23_s18 = int_to_ptr.vmem [resolvable:$true] %s22_s18 }
   0x5   :  { %s198_s21 = scalar_lea.hbm %s416_s1, 128 }
   0x6   :  { %p199_p0 = scmp.ne.s32.totalorder %s416_s1, %s198_s21  ;;  %p202_p1 = scmp.lt.u32.totalorder %s198_s21, %s416_s1 }
   0x8   :  { %p204_p2 = pnand %p202_p1, %p199_p0 }
   0xa   :  { %207 = shalt.err (!%p204_p2)
}
   0xb   :  { %s208_s26 = scalar_lea.vmem %s36_s16, 128  ;;  %p213_p4 = scmp.lt.s32.totalorder %s36_s16, %s36_s16 }
   0xc   :  { %p209_p3 = scmp.ne.s32.totalorder %s36_s16, %s208_s26  ;;  %p214_p5 = scmp.lt.s32.totalorder %s208_s26, %s208_s26 }
   0xe   :  { %p215_p6 = por %p214_p5, %p213_p4 }
  0x10   :  { %p216_p7 = pnand %p215_p6, %p209_p3 }
  0x12   :  { %219 = shalt.err (!%p216_p7)
}
  0x13   :  { %38 = dma.hbm_to_vmem [thread:$0]  %s416_s1, 128, %s36_s16, [#allocation8]  }
  0x14   :  { %s220_s5 = scalar_lea.hbm %s415_s0, 128 }
  0x15   :  { %p221_p8 = scmp.ne.s32.totalorder %s415_s0, %s220_s5  ;;  %p224_p9 = scmp.lt.u32.totalorder %s220_s5, %s415_s0 }
  0x17   :  { %p226_p10 = pnand %p224_p9, %p221_p8 }
  0x19   :  { %229 = shalt.err (!%p226_p10)
}
  0x1a   :  { %s230_s10 = scalar_lea.vmem %s23_s18, 128  ;;  %p235_p12 = scmp.lt.s32.totalorder %s23_s18, %s23_s18 }
  0x1b   :  { %p231_p11 = scmp.ne.s32.totalorder %s23_s18, %s230_s10  ;;  %p236_p13 = scmp.lt.s32.totalorder %s230_s10, %s230_s10 }
  0x1d   :  { %p237_p0 = por %p236_p13, %p235_p12 }
  0x1f   :  { %p238_p1 = pnand %p237_p0, %p231_p11 }
  0x21   :  { %241 = shalt.err (!%p238_p1)
}
  0x22   :  { %25 = dma.hbm_to_vmem [thread:$0]  %s415_s0, 128, %s23_s18, [#allocation5]  }
  0x23   :  { %s318_s12 = smov [#allocation9]   ;;  %s319_s14 = smov [#allocation10]  }
  0x24   :  { %s48_s13 = sshll.u32 %s318_s12, 4  ;;  %s61_s15 = sshll.u32 %s319_s14, 4  ;;  %s49_s13 = int_to_ptr.vmem [resolvable:$true] %s48_s13  ;;  %s62_s15 = int_to_ptr.vmem [resolvable:$true] %s61_s15 }
  0x25   :  { %s242_s19 = scalar_lea.hbm %s417_s2, 128 }
  0x26   :  { %p243_p2 = scmp.ne.s32.totalorder %s417_s2, %s242_s19  ;;  %p246_p3 = scmp.lt.u32.totalorder %s242_s19, %s417_s2 }
  0x28   :  { %p248_p4 = pnand %p246_p3, %p243_p2 }
  0x2a   :  { %251 = shalt.err (!%p248_p4)
}
  0x2b   :  { %s252_s0 = scalar_lea.vmem %s49_s13, 128  ;;  %p257_p6 = scmp.lt.s32.totalorder %s49_s13, %s49_s13 }
  0x2c   :  { %p253_p5 = scmp.ne.s32.totalorder %s49_s13, %s252_s0  ;;  %p258_p7 = scmp.lt.s32.totalorder %s252_s0, %s252_s0 }
  0x2e   :  { %p259_p8 = por %p258_p7, %p257_p6 }
  0x30   :  { %p260_p9 = pnand %p259_p8, %p253_p5 }
  0x32   :  { %263 = shalt.err (!%p260_p9)
}
  0x33   :  { %51 = dma.hbm_to_vmem [thread:$0]  %s417_s2, 128, %s49_s13, [#allocation8]  }
  0x34   :  { %s264_s27 = scalar_lea.hbm %s418_s3, 128 }
  0x35   :  { %p265_p10 = scmp.ne.s32.totalorder %s418_s3, %s264_s27  ;;  %p268_p11 = scmp.lt.u32.totalorder %s264_s27, %s418_s3 }
  0x37   :  { %p270_p12 = pnand %p268_p11, %p265_p10 }
  0x39   :  { %273 = shalt.err (!%p270_p12)
}
  0x3a   :  { %s274_s6 = scalar_lea.vmem %s62_s15, 128  ;;  %p279_p0 = scmp.lt.s32.totalorder %s62_s15, %s62_s15 }
  0x3b   :  { %p275_p13 = scmp.ne.s32.totalorder %s62_s15, %s274_s6  ;;  %p280_p1 = scmp.lt.s32.totalorder %s274_s6, %s274_s6 }
  0x3d   :  { %p281_p2 = por %p280_p1, %p279_p0 }
  0x3f   :  { %p282_p3 = pnand %p281_p2, %p275_p13 }
  0x41   :  { %285 = shalt.err (!%p282_p3)
}
  0x42   :  { %64 = dma.hbm_to_vmem [thread:$0]  %s418_s3, 128, %s62_s15, [#allocation11]  }
  0x43   :  { %308 = dma.done.wait [#allocation5], 128  }
  0x44   :  { %309 = vsyncadd [#allocation5], 4294967168 }
  0x45   :  { %310 = dma.done.wait [#allocation8], 256  }
  0x46   :  { %311 = vsyncadd [#allocation8], 4294967040 }
  0x47   :  { %312 = dma.done.wait [#allocation11], 128  }
  0x48   :  { %313 = vsyncadd [#allocation11], 4294967168  ;;  %vm96_vm0 = vcmask 130048   ;;  %v95_v0 = vld [vmem:[#allocation7] sm:$0xff]  ;;  %v117_v2 = vld [vmem:[#allocation10] sm:$0xff]  ;;  %vm85_vm1 = vcmask 7168   ;;  %v90_v46 = vlaneseq }
  0x49   :  { %v97_v1 = vsel %vm96_vm0, %v95_v0, -inf  ;;  %v121_v3 = vmul.f32 1.442695, %v117_v2  ;;  %v116_v4 = vld [vmem:[#allocation9] sm:$0xff]  ;;  %v118_v5 = vadd.f32 1.0, %v117_v2  ;;  %v320_v7 = vmov 0.0  }
  0x4a   :  { %98 = vmax.xlane.f32.xlu0 %v97_v1  ;;  %v119_v6 = vmul.f32 %v116_v4, %v116_v4  ;;  %86 = vst.msk [vmem:[#allocation2] sm:$0xff] %vm85_vm1, %v320_v7  ;;  %87 = vst.msk [vmem:[#allocation3] sm:$0xff] %vm85_vm1, %v320_v7  ;;  %vm124_vm2 = vcmask 261120   ;;  %v109_v25 = vld [vmem:[#allocation4] sm:$0xff]  ;;  %v91_v47 = vshrl.u32 %v90_v46, 7  ;;  %s321_s9 = smov [#allocation12]  }
  0x4b   :  { %192 = vpow2.f32 %v121_v3  ;;  %s171_s10 = sshll.u32 %s321_s9, 4  ;;  %s172_s10 = int_to_ptr.vmem [resolvable:$true] %s171_s10 }
  0x4c   :  { %v120_v8 = vsub.f32 %v118_v5, %v119_v6  ;;  %vm157_vm3 = vcmp.eq.s32.totalorder %v91_v47, 0  ;;  %vm160_vm4 = vcmp.eq.s32.totalorder %v91_v47, 1  ;;  %s286_s1 = scalar_lea.vmem %s172_s10, 128  ;;  %p291_p5 = scmp.lt.s32.totalorder %s172_s10, %s172_s10 }
  0x4d   :  { %p287_p4 = scmp.ne.s32.totalorder %s172_s10, %s286_s1  ;;  %p292_p6 = scmp.lt.s32.totalorder %s286_s1, %s286_s1 }
  0x4f   :  { %p293_p7 = por %p292_p6, %p291_p5 }
  0x51   :  { %v128_v18 = vld [vmem:[#allocation3] sm:$0xff]  ;;  %v111_v27 = vld [vmem:[#allocation2] sm:$0xff]  ;;  %p294_p8 = pnand %p293_p7, %p287_p4 }
  0x55   :  { %v193_v9 = vpop.eup %192 }
  0x56   :  { %v123_v10 = vsub.f32 %v120_v8, %v193_v9 }
  0x58   :  { %v125_v11 = vsel %vm124_vm2, %v123_v10, 0.0 }
  0x59   :  { %126 = vadd.xlane.f32.xlu1 %v125_v11 }
  0xd7   :  { %v99_v12 = vpop.xlane.xlu0 %98 }
  0xd8   :  { %v100_v13 = vsub.f32 %v95_v0, %v99_v12 }
  0xda   :  { %v101_v14 = vmul.f32 1.442695, %v100_v13 }
  0xdc   :  { %194 = vpow2.f32 %v101_v14 }
  0xe6   :  { %v195_v15 = vpop.eup %194  ;;  %v127_v17 = vpop.xlane.xlu1 %126 }
  0xe7   :  { %v103_v16 = vsel %vm96_vm0, %v195_v15, 0.0  ;;  %v130_v19 = vadd.f32 %v128_v18, %v127_v17 }
  0xe8   :  { %104 = vadd.xlane.f32.xlu0 %v103_v16 }
  0xe9   :  { %131 = vst.msk [vmem:[#allocation3] sm:$0xff] %vm85_vm1, %v130_v19 }
  0xf0   :  { %v146_v20 = vld [vmem:[#allocation3] sm:$0xff] }
  0xf1   :  { %v147_v21 = vsel %vm85_vm1, %v146_v20, 0.0 }
  0xf2   :  { %148 = vadd.xlane.f32.xlu0 %v147_v21 }
 0x175   :  { %v105_v22 = vpop.xlane.xlu0 %104 }
 0x176   :  { %196 = vlog2.f32 %v105_v22 }
 0x17f   :  { %v149_v32 = vpop.xlane.xlu0 %148 }
 0x180   :  { %v197_v23 = vpop.eup %196  ;;  %v150_v33 = vrot.slane %v149_v32, 4 }
 0x181   :  { %v107_v24 = vmul.f32 0.6931472, %v197_v23 }
 0x182   :  { %v151_v34 = vadd.f32 %v150_v33, %v149_v32 }
 0x183   :  { %v108_v26 = vadd.f32 %v107_v24, %v99_v12 }
 0x184   :  { %v152_v35 = vrot.slane %v151_v34, 2 }
 0x185   :  { %v110_v28 = vsub.f32 %v108_v26, %v109_v25 }
 0x186   :  { %v153_v39 = vadd.f32 %v152_v35, %v151_v34 }
 0x187   :  { %v113_v29 = vadd.f32 %v111_v27, %v110_v28 }
 0x188   :  { %v154_v42 = vrot.slane %v153_v39, 1 }
 0x189   :  { %115 = vst.msk [vmem:[#allocation2] sm:$0xff] %vm85_vm1, %v113_v29 }
 0x18a   :  { %v155_v45 = vadd.f32 %v154_v42, %v153_v39 }
 0x190   :  { %v135_v30 = vld [vmem:[#allocation2] sm:$0xff] }
 0x191   :  { %v136_v31 = vsel %vm85_vm1, %v135_v30, 0.0 }
 0x192   :  { %137 = vadd.xlane.f32.xlu1 %v136_v31 }
 0x21f   :  { %v138_v36 = vpop.xlane.xlu1 %137 }
 0x220   :  { %v139_v37 = vrot.slane %v138_v36, 4 }
 0x222   :  { %v140_v38 = vadd.f32 %v139_v37, %v138_v36 }
 0x224   :  { %v141_v40 = vrot.slane %v140_v38, 2 }
 0x226   :  { %v142_v41 = vadd.f32 %v141_v40, %v140_v38 }
 0x228   :  { %v143_v43 = vrot.slane %v142_v41, 1 }
 0x22a   :  { %v144_v44 = vadd.f32 %v143_v43, %v142_v41 }
 0x22c   :  { %182 = vpush %v144_v44 }
 0x22d   :  { %184 = vpush %v155_v45 }
 0x25d   :  { %s183_s3 = spop %182 }
 0x25e   :  { %v158_v48 = vstv %s183_s3  ;;  %s185_s8 = spop %184 }
 0x25f   :  { %v159_v49 = vsel %vm157_vm3, %v158_v48, 0.0  ;;  %v161_v50 = vstv %s185_s8 }
 0x260   :  { %v162_v51 = vsel %vm160_vm4, %v161_v50, 0.0 }
 0x261   :  { %v163_v52 = vadd.f32 %v162_v51, %v159_v49 }
 0x263   :  { %164 = vst [vmem:[#allocation12] sm:$0xff] %v163_v52 }
 0x264   :  { %297 = shalt.err (!%p294_p8)
}
 0x265   :  { %s298_s13 = scalar_lea.hbm %s419_s4, 128 }
 0x266   :  { %p299_p9 = scmp.ne.s32.totalorder %s419_s4, %s298_s13  ;;  %p302_p10 = scmp.lt.u32.totalorder %s298_s13, %s419_s4 }
 0x268   :  { %p304_p11 = pnand %p302_p10, %p299_p9 }
 0x26a   :  { %307 = shalt.err (!%p304_p11)
}
 0x26b   :  { %174 = dma.vmem_to_hbm [thread:$0]  %s172_s10, 128, %s419_s4, [#allocation6]  }
 0x26c   :  { %314 = dma.done.wait [#allocation6], 128  }
 0x26d   :  { %315 = vsyncadd [#allocation6], 4294967168 }
 0x26e   :  { %178 = vsyncpa [#allocation5], 1 }
 0x26f   :  { %179 = vsyncpa [#allocation8], 1 }
 0x270   :  { %180 = vsyncpa [#allocation11], 1 }
 0x271   :  { %181 = vsyncpa [#allocation6], 1 }

// kernel: tpu_custom_call.1
= control target key start
LH: loop header
LB: loop body
LE: loop exit
PB: predicated region body
PF: predicated region fallthrough
CT: control target
= control target key end

     0   :  { %9 = vsyncpa [#allocation5], 0  ;;  %s332_s0 = inlined_call_operand.vmem [shape: f32[8,1], index: 0, kind: input, shape index: {}]   ;;  %s333_s1 = inlined_call_operand.vmem [shape: f32[8,16], index: 1, kind: input, shape index: {}]   ;;  %s334_s2 = inlined_call_operand.vmem [shape: f32[8,32], index: 2, kind: input, shape index: {}]   ;;  %s335_s3 = inlined_call_operand.hbm [shape: f32[8,32], index: 3, kind: input, shape index: {}]   ;;  %s336_s4 = inlined_call_operand.hbm [shape: f32[1,8,128], index: 4, kind: output, shape index: {}]  }
   0x1   :  { %10 = vsyncpa [#allocation6], 0  ;;  %s263_s15 = smov [#allocation4]   ;;  %s215_s19 = scalar_lea.hbm %s335_s3, 128 }
   0x2   :  { %s44_s16 = sshll.u32 %s263_s15, 4  ;;  %p216_p0 = scmp.ne.s32.totalorder %s335_s3, %s215_s19  ;;  %s45_s16 = int_to_ptr.vmem [resolvable:$true] %s44_s16 }
   0x3   :  { %p219_p1 = scmp.lt.u32.totalorder %s215_s19, %s335_s3 }
   0x5   :  { %p221_p2 = pnand %p219_p1, %p216_p0 }
   0x7   :  { %224 = shalt.err (!%p221_p2)
}
   0x8   :  { %s225_s24 = scalar_lea.vmem %s45_s16, 128  ;;  %p230_p4 = scmp.lt.s32.totalorder %s45_s16, %s45_s16 }
   0x9   :  { %p226_p3 = scmp.ne.s32.totalorder %s45_s16, %s225_s24  ;;  %p231_p5 = scmp.lt.s32.totalorder %s225_s24, %s225_s24 }
   0xb   :  { %p232_p6 = por %p231_p5, %p230_p4 }
   0xd   :  { %p233_p7 = pnand %p232_p6, %p226_p3 }
   0xf   :  { %236 = shalt.err (!%p233_p7)
}
  0x10   :  { %47 = dma.hbm_to_vmem [thread:$0]  %s335_s3, 128, %s45_s16, [#allocation5]  }
  0x11   :  { %259 = dma.done.wait [#allocation5], 128  }
  0x12   :  { %260 = vsyncadd [#allocation5], 4294967168  ;;  %vm100_vm0 = vcmask 130048   ;;  %v99_v0 = vld [vmem:[%s333_s1] sm:$0xff]  ;;  %v121_v2 = vld [vmem:[#allocation4] sm:$0xff]  ;;  %vm89_vm1 = vcmask 7168   ;;  %v94_v46 = vlaneseq }
  0x13   :  { %v101_v1 = vsel %vm100_vm0, %v99_v0, -inf  ;;  %v125_v3 = vmul.f32 1.442695, %v121_v2  ;;  %v120_v4 = vld [vmem:[%s334_s2] sm:$0xff]  ;;  %v122_v5 = vadd.f32 1.0, %v121_v2  ;;  %v264_v7 = vmov 0.0  }
  0x14   :  { %102 = vmax.xlane.f32.xlu0 %v101_v1  ;;  %v123_v6 = vmul.f32 %v120_v4, %v120_v4  ;;  %90 = vst.msk [vmem:[#allocation2] sm:$0xff] %vm89_vm1, %v264_v7  ;;  %91 = vst.msk [vmem:[#allocation3] sm:$0xff] %vm89_vm1, %v264_v7  ;;  %vm128_vm2 = vcmask 261120   ;;  %v113_v25 = vld [vmem:[%s332_s0] sm:$0xff]  ;;  %v95_v47 = vshrl.u32 %v94_v46, 7  ;;  %s265_s5 = smov [#allocation7]  }
  0x15   :  { %209 = vpow2.f32 %v125_v3  ;;  %s175_s6 = sshll.u32 %s265_s5, 4  ;;  %s176_s6 = int_to_ptr.vmem [resolvable:$true] %s175_s6 }
  0x16   :  { %v124_v8 = vsub.f32 %v122_v5, %v123_v6  ;;  %vm161_vm3 = vcmp.eq.s32.totalorder %v95_v47, 0  ;;  %vm164_vm4 = vcmp.eq.s32.totalorder %v95_v47, 1  ;;  %s237_s7 = scalar_lea.vmem %s176_s6, 128  ;;  %p242_p9 = scmp.lt.s32.totalorder %s176_s6, %s176_s6 }
  0x17   :  { %p238_p8 = scmp.ne.s32.totalorder %s176_s6, %s237_s7  ;;  %p243_p10 = scmp.lt.s32.totalorder %s237_s7, %s237_s7 }
  0x19   :  { %p244_p11 = por %p243_p10, %p242_p9 }
  0x1b   :  { %v132_v18 = vld [vmem:[#allocation3] sm:$0xff]  ;;  %v115_v27 = vld [vmem:[#allocation2] sm:$0xff]  ;;  %p245_p12 = pnand %p244_p11, %p238_p8 }
  0x1f   :  { %v210_v9 = vpop.eup %209 }
  0x20   :  { %v127_v10 = vsub.f32 %v124_v8, %v210_v9 }
  0x22   :  { %v129_v11 = vsel %vm128_vm2, %v127_v10, 0.0 }
  0x23   :  { %130 = vadd.xlane.f32.xlu1 %v129_v11 }
  0xa1   :  { %v103_v12 = vpop.xlane.xlu0 %102 }
  0xa2   :  { %v104_v13 = vsub.f32 %v99_v0, %v103_v12 }
  0xa4   :  { %v105_v14 = vmul.f32 1.442695, %v104_v13 }
  0xa6   :  { %211 = vpow2.f32 %v105_v14 }
  0xb0   :  { %v212_v15 = vpop.eup %211  ;;  %v131_v17 = vpop.xlane.xlu1 %130 }
  0xb1   :  { %v107_v16 = vsel %vm100_vm0, %v212_v15, 0.0  ;;  %v134_v19 = vadd.f32 %v132_v18, %v131_v17 }
  0xb2   :  { %108 = vadd.xlane.f32.xlu0 %v107_v16 }
  0xb3   :  { %135 = vst.msk [vmem:[#allocation3] sm:$0xff] %vm89_vm1, %v134_v19 }
  0xba   :  { %v150_v20 = vld [vmem:[#allocation3] sm:$0xff] }
  0xbb   :  { %v151_v21 = vsel %vm89_vm1, %v150_v20, 0.0 }
  0xbc   :  { %152 = vadd.xlane.f32.xlu0 %v151_v21 }
 0x13f   :  { %v109_v22 = vpop.xlane.xlu0 %108 }
 0x140   :  { %213 = vlog2.f32 %v109_v22 }
 0x149   :  { %v153_v32 = vpop.xlane.xlu0 %152 }
 0x14a   :  { %v214_v23 = vpop.eup %213  ;;  %v154_v33 = vrot.slane %v153_v32, 4 }
 0x14b   :  { %v111_v24 = vmul.f32 0.6931472, %v214_v23 }
 0x14c   :  { %v155_v34 = vadd.f32 %v154_v33, %v153_v32 }
 0x14d   :  { %v112_v26 = vadd.f32 %v111_v24, %v103_v12 }
 0x14e   :  { %v156_v35 = vrot.slane %v155_v34, 2 }
 0x14f   :  { %v114_v28 = vsub.f32 %v112_v26, %v113_v25 }
 0x150   :  { %v157_v39 = vadd.f32 %v156_v35, %v155_v34 }
 0x151   :  { %v117_v29 = vadd.f32 %v115_v27, %v114_v28 }
 0x152   :  { %v158_v42 = vrot.slane %v157_v39, 1 }
 0x153   :  { %119 = vst.msk [vmem:[#allocation2] sm:$0xff] %vm89_vm1, %v117_v29 }
 0x154   :  { %v159_v45 = vadd.f32 %v158_v42, %v157_v39 }
 0x15a   :  { %v139_v30 = vld [vmem:[#allocation2] sm:$0xff] }
 0x15b   :  { %v140_v31 = vsel %vm89_vm1, %v139_v30, 0.0 }
 0x15c   :  { %141 = vadd.xlane.f32.xlu1 %v140_v31 }
 0x1e9   :  { %v142_v36 = vpop.xlane.xlu1 %141 }
 0x1ea   :  { %v143_v37 = vrot.slane %v142_v36, 4 }
 0x1ec   :  { %v144_v38 = vadd.f32 %v143_v37, %v142_v36 }
 0x1ee   :  { %v145_v40 = vrot.slane %v144_v38, 2 }
 0x1f0   :  { %v146_v41 = vadd.f32 %v145_v40, %v144_v38 }
 0x1f2   :  { %v147_v43 = vrot.slane %v146_v41, 1 }
 0x1f4   :  { %v148_v44 = vadd.f32 %v147_v43, %v146_v41 }
 0x1f6   :  { %202 = vpush %v148_v44 }
 0x1f7   :  { %204 = vpush %v159_v45 }
 0x227   :  { %s203_s0 = spop %202 }
 0x228   :  { %v162_v48 = vstv %s203_s0  ;;  %s205_s3 = spop %204 }
 0x229   :  { %v163_v49 = vsel %vm161_vm3, %v162_v48, 0.0  ;;  %v165_v50 = vstv %s205_s3 }
 0x22a   :  { %v166_v51 = vsel %vm164_vm4, %v165_v50, 0.0 }
 0x22b   :  { %v167_v52 = vadd.f32 %v166_v51, %v163_v49 }
 0x22d   :  { %168 = vst [vmem:[#allocation7] sm:$0xff] %v167_v52 }
 0x22e   :  { %248 = shalt.err (!%p245_p12)
}
 0x22f   :  { %s249_s10 = scalar_lea.hbm %s336_s4, 128 }
 0x230   :  { %p250_p13 = scmp.ne.s32.totalorder %s336_s4, %s249_s10  ;;  %p253_p0 = scmp.lt.u32.totalorder %s249_s10, %s336_s4 }
 0x232   :  { %p255_p1 = pnand %p253_p0, %p250_p13 }
 0x234   :  { %258 = shalt.err (!%p255_p1)
}
 0x235   :  { %178 = dma.vmem_to_hbm [thread:$0]  %s176_s6, 128, %s336_s4, [#allocation6]  }
 0x236   :  { %261 = dma.done.wait [#allocation6], 128  }
 0x237   :  { %262 = vsyncadd [#allocation6], 4294967168 }
 0x238   :  { %182 = vsyncpa [#allocation5], 1 }
 0x239   :  { %183 = vsyncpa [#allocation6], 1 }

</bundles_post_ra>
